<compile_context>
chip_gen: v7x
topology: tpu7x:2x2x1
jax: 0.10.0
libtpu: 0.0.40
codegen_flags: <defaults>
</compile_context>

<pallas_src>
import math

import jax
import jax.numpy as jnp
from jax.experimental import pallas as pl
from jax.experimental.pallas import tpu as pltpu

LANE = 128       # vreg lane width (last dim)
SUBLANE = 8      # vreg sublane width (second-to-last dim)


def _round_up(v, m):
    return -(-v // m) * m


def _chip_vmem_bytes():
    """Physical VMEM of the current chip; conservative (v7x) fallback."""
    try:
        return int(pltpu.get_tpu_info().vmem_capacity_bytes)
    except Exception:
        return 64 * 1024 * 1024


# ---------------------------------------------------------------------------
# Pallas kernel: fused 3-layer MLP on one (TM, D) row tile
# ---------------------------------------------------------------------------
def _mlp3_kernel(x_ref, w1_ref, b1_ref, w2_ref, b2_ref, w3_ref, b3_ref, o_ref):
    """Linear->ReLU->Linear->ReLU->Linear, activations VMEM/vreg resident.

    Dots accumulate in f32 via preferred_element_type; the x -> bf16 cast (when the
    hidden weights are bf16) happens HERE, on VMEM-resident data, instead of as a
    separate HBM pass in the wrapper.  Bias add / ReLU stay f32 (v5e has no bf16 VPU),
    and the final (D -> 8) dot is f32 to keep the head numerically tight.
    """
    cdt = w1_ref.dtype                      # hidden dot-operand dtype (f32 or bf16)
    x = x_ref[...].astype(cdt)
    h = jnp.dot(x, w1_ref[...], preferred_element_type=jnp.float32)
    h = jnp.maximum(h + b1_ref[...], 0.0)
    h = jnp.dot(h.astype(w2_ref.dtype), w2_ref[...], preferred_element_type=jnp.float32)
    h = jnp.maximum(h + b2_ref[...], 0.0)
    y = jnp.dot(h.astype(w3_ref.dtype), w3_ref[...], preferred_element_type=jnp.float32)
    o_ref[...] = (y + b3_ref[...]).astype(o_ref.dtype)


def fused_mlp3(x2d, layers, *, block_rows=None, dot_dtype=jnp.bfloat16,
               min_pallas_rows=64):
    """x2d: [N, D] f32; layers: [(w1,b1),(w2,b2),(w3,b3)] with w as [in,out] -> [N, C] f32."""
    (w1, b1), (w2, b2), (w3, b3) = layers
    n, d = x2d.shape
    h1, h2, c = w1.shape[1], w2.shape[1], w3.shape[1]

    # Tiny-shape fallback: at toy sizes the kernel is pure launch/pipeline-fill overhead.
    if n < min_pallas_rows:
        h = jnp.maximum(x2d @ w1 + b1, 0.0)
        h = jnp.maximum(h @ w2 + b2, 0.0)
        return h @ w3 + b3

    # ---- chip-aware VMEM budget / limits / default row tile --------------------
    vmem_cap = _chip_vmem_bytes()
    if vmem_cap >= 96 * 1024 * 1024:        # v5e / v6e: 128 MiB physical VMEM
        vmem_budget, vmem_limit = 48 << 20, 64 << 20
        default_block_rows = 1024
    else:                                    # v7x: 64 MiB physical per TC
        vmem_budget, vmem_limit = 20 << 20, 28 << 20
        default_block_rows = 512
    if block_rows is None:
        block_rows = default_block_rows

    # ---- output head: pad 7 -> 8, NOT to 128 lanes ------------------------------
    # Last block dim == full array dim (8) is legal, and the f32 writeback becomes
    # 32 B/row instead of 512 B/row (it would otherwise be the largest HBM stream).
    cp = _round_up(c, SUBLANE)
    w3p = jnp.pad(w3, ((0, 0), (0, cp - c))).astype(jnp.float32)   # final dot stays f32
    b3r = jnp.pad(b3, (0, cp - c)).astype(jnp.float32).reshape(1, cp)

    # Hidden-layer weights in dot_dtype (bf16 default).  x itself is NOT cast here.
    w1c = w1.astype(dot_dtype)
    w2c = w2.astype(dot_dtype)
    b1r = b1.reshape(1, h1).astype(jnp.float32)
    b2r = b2.reshape(1, h2).astype(jnp.float32)

    x_bytes = x2d.dtype.itemsize
    w_bytes = jnp.dtype(dot_dtype).itemsize

    def _vmem_estimate(tm_, xo_buffers, w_buffers):
        x_blk = tm_ * d * x_bytes
        o_blk = tm_ * cp * 4
        w_blk = ((d * h1 + h1 * h2) * w_bytes + h2 * cp * 4 + (h1 + h2 + cp) * 4)
        return xo_buffers * (x_blk + o_blk) + w_buffers * w_blk

    # Row tile: as big as fits VMEM (sublane multiple), but capped so the
    # ("parallel",) grid has >= ~4 steps — keeps both v7x TCs fed and the pipeline full.
    tm = _round_up(min(block_rows, n), SUBLANE)
    tm = min(tm, _round_up(-(-n // 4), SUBLANE))
    tm = max(tm, SUBLANE)
    while tm > SUBLANE and _vmem_estimate(tm, 3, 1) > vmem_budget:
        tm = _round_up(max(tm // 2, SUBLANE), SUBLANE)

    np_rows = _round_up(n, tm)
    xp = x2d if np_rows == n else jnp.pad(x2d, ((0, np_rows - n), (0, 0)))
    grid_len = np_rows // tm

    flops = 2 * np_rows * (d * h1 + h1 * h2 + h2 * cp)
    bytes_accessed = (np_rows * d * x_bytes                       # x read (f32, once)
                      + (d * h1 + h1 * h2) * w_bytes + h2 * cp * 4
                      + (h1 + h2 + cp) * 4                        # weights / biases
                      + np_rows * cp * 4)                         # thin f32 writeback
    cost = pl.CostEstimate(flops=flops, transcendentals=0,
                           bytes_accessed=bytes_accessed)

    def _run(use_pipeline_mode):
        xo_kw, w_kw = {}, {}
        if use_pipeline_mode:
            # Constant-index (revisited) weight/bias blocks are DMA'd once -> no need
            # for a second buffer; frees VMEM for bigger row tiles at real embed dims.
            w_kw = dict(pipeline_mode=pl.Buffered(1))
            if grid_len <= 4:
                # Short grid: per-tile compute is small, deepen x/out buffering to
                # hide DMA latency (negligible VMEM cost at these tile sizes).
                xo_kw = dict(pipeline_mode=pl.Buffered(3))

        in_specs = [
            pl.BlockSpec((tm, d), lambda i: (i, 0), **xo_kw),     # x row tile
            pl.BlockSpec((d, h1), lambda i: (0, 0), **w_kw),      # w1 (resident)
            pl.BlockSpec((1, h1), lambda i: (0, 0), **w_kw),      # b1
            pl.BlockSpec((h1, h2), lambda i: (0, 0), **w_kw),     # w2
            pl.BlockSpec((1, h2), lambda i: (0, 0), **w_kw),      # b2
            pl.BlockSpec((h2, cp), lambda i: (0, 0), **w_kw),     # w3 (8-wide, f32)
            pl.BlockSpec((1, cp), lambda i: (0, 0), **w_kw),      # b3
        ]
        out_spec = pl.BlockSpec((tm, cp), lambda i: (i, 0), **xo_kw)

        return pl.pallas_call(
            _mlp3_kernel,
            out_shape=jax.ShapeDtypeStruct((np_rows, cp), jnp.float32),
            grid_spec=pltpu.PrefetchScalarGridSpec(
                num_scalar_prefetch=0,
                grid=(grid_len,),
                in_specs=in_specs,
                out_specs=out_spec,
            ),
            compiler_params=pltpu.CompilerParams(
                dimension_semantics=("parallel",),   # rows independent -> megacore split
                vmem_limit_bytes=vmem_limit,
            ),
            cost_estimate=cost,
        )(xp, w1c, b1r, w2c, b2r, w3p, b3r)

    if hasattr(pl, "Buffered"):
        try:
            out = _run(True)
        except Exception:
            # pipeline_mode / Buffered not supported by this build — identical kernel,
            # default double-buffering everywhere.
            out = _run(False)
    else:
        out = _run(False)

    return out[:n, :c]


# ---------------------------------------------------------------------------
# Small JAX re-implementations of external deps (pytorch3d / cubify containers)
# ---------------------------------------------------------------------------
def _axis_rotation(axis, angle):
    cos, sin = jnp.cos(angle), jnp.sin(angle)
    one, zero = jnp.ones_like(angle), jnp.zeros_like(angle)
    if axis == "X":
        flat = (one, zero, zero, zero, cos, -sin, zero, sin, cos)
    elif axis == "Y":
        flat = (cos, zero, sin, zero, one, zero, -sin, zero, cos)
    else:  # "Z"
        flat = (cos, -sin, zero, sin, cos, zero, zero, zero, one)
    return jnp.stack(flat, axis=-1).reshape(angle.shape + (3, 3))


def euler_angles_to_matrix(euler_angles, convention):
    mats = [_axis_rotation(c, euler_angles[..., i]) for i, c in enumerate(convention)]
    return mats[0] @ mats[1] @ mats[2]


class WhitenedDepthMeasurementInfo:
    def __init__(self, parameters):
        self.parameters = parameters          # [..., 2] = (shift, scale)


class Proposals:
    """Stand-in for the Instances-like per-image proposal container."""
    def __init__(self, pred_boxes):
        self.pred_boxes = pred_boxes          # [Q, 4] = (x, y, w, h)
        self.proposal_boxes = pred_boxes


class _ImageData:
    def __init__(self, tensor):
        self.tensor = tensor


class _SensorEntry:
    def __init__(self, data, info):
        self.data = data
        self.info = info


# ---------------------------------------------------------------------------
# AbsoluteBox3DPredictor in JAX, MLP hot path in Pallas
# ---------------------------------------------------------------------------
class AbsoluteBox3DPredictorPallas:
    CENTER_2D_DIM = 2
    Z_DIM = 1
    DIMS_DIM = 3
    POSE_DIM = 1

    def __init__(self, embed_dim, pose_type="z", z_type="direct", scale_shift=True,
                 num_layers=3, pred_proj_rel_pred_box=True, clamp_xy_to_border=True,
                 dot_dtype=jnp.bfloat16, block_rows=None, key=jax.random.PRNGKey(0)):
        self.embed_dim = embed_dim
        self.pose_type = pose_type
        self.z_type = z_type
        self.scale_shift = scale_shift
        self.num_layers = num_layers
        self.pred_proj_rel_pred_box = pred_proj_rel_pred_box
        self.clamp_xy_to_border = clamp_xy_to_border
        self.dot_dtype = dot_dtype
        self.block_rows = block_rows

        out_dim = self.CENTER_2D_DIM + self.Z_DIM + self.DIMS_DIM + self.POSE_DIM  # = 7
        # MLP(embed_dim, embed_dim, out_dim, 3) — hardcoded 3 layers in the reference.
        mlp_layers = 3
        dims = [embed_dim] + [embed_dim] * (mlp_layers - 1) + [out_dim]
        layers = []
        keys = jax.random.split(key, mlp_layers)
        for li, (n_in, n_out) in enumerate(zip(dims[:-1], dims[1:])):
            kw, kb = jax.random.split(keys[li])
            bound = 1.0 / math.sqrt(n_in)
            # weights stored [in, out] (transpose of PyTorch's [out, in])
            w = jax.random.uniform(kw, (n_in, n_out), minval=-bound, maxval=bound,
                                   dtype=jnp.float32)
            b = jax.random.uniform(kb, (n_out,), minval=-bound, maxval=bound,
                                   dtype=jnp.float32)
            layers.append([w, b])
        # nn.init.constant_(last.weight[:2], 0); nn.init.constant_(last.bias[:2], 0)
        layers[-1][0] = layers[-1][0].at[:, :self.CENTER_2D_DIM].set(0.0)
        layers[-1][1] = layers[-1][1].at[:self.CENTER_2D_DIM].set(0.0)
        self.layers = [tuple(l) for l in layers]

    @property
    def gravity_aligned(self):
        return self.pose_type == "z"

    def _parameters_of(self, info):
        if isinstance(info, WhitenedDepthMeasurementInfo):
            return info.parameters
        return info.pred_parameters

    def _mlp(self, x):
        bsz, q, d = x.shape
        y = fused_mlp3(x.reshape(bsz * q, d), self.layers,
                       block_rows=self.block_rows, dot_dtype=self.dot_dtype)
        return y.reshape(bsz, q, -1)

    def forward(self, x, proposals, sensor):
        batch_size = x.shape[0]
        y = self._mlp(x)  # [B, Q, 7] via fused Pallas kernel
        box_2d_deltas = y[..., :self.CENTER_2D_DIM]
        box_z_unscaled = y[..., self.CENTER_2D_DIM:self.CENTER_2D_DIM + self.Z_DIM]
        box_dims = y[..., self.CENTER_2D_DIM + self.Z_DIM:
                        self.CENTER_2D_DIM + self.Z_DIM + self.DIMS_DIM]
        box_pose = y[..., -self.POSE_DIM:]

        if self.pose_type == "z":
            # 'YXZ' Euler with angles (theta, 0, 0) is exactly R_Y(theta); build it
            # directly instead of three 3x3 matrices and two batched matmuls.
            theta = box_pose[..., 0]
            cos, sin = jnp.cos(theta), jnp.sin(theta)
            zero, one = jnp.zeros_like(theta), jnp.ones_like(theta)
            box_pose = jnp.stack(
                [cos, zero, sin, zero, one, zero, -sin, zero, cos],
                axis=-1).reshape(batch_size, -1, 3, 3)

        scale_infos = sensor["depth"].info if "depth" in sensor else sensor["image"].info

        scale = None
        if self.scale_shift:
            # Vectorized over the batch: one stacked [B, 1, 2] parameter tensor instead
            # of B small per-image XLA dispatches.
            params = jnp.stack([self._parameters_of(i) for i in scale_infos], axis=0)
            shift, scale = params[..., :1], params[..., 1:]
            box_z_scaled = scale * box_z_unscaled + shift
        else:
            box_z_scaled = box_z_unscaled

        box_dims = jnp.exp(jnp.minimum(box_dims, 5.0))  # == exp(clip(., max=5))
        if self.scale_shift:
            box_dims = scale * box_dims

        clamp_shape = sensor["image"].data.tensor.shape[-2:]  # (H, W)
        # TODO(synk): per-image attribute attachment on Instances-like containers is
        # host-side Python plumbing with no Pallas equivalent; kept as a plain loop.
        for (deltas_, z_un_, z_sc_, dims_, pose_, proposals_, info_) in zip(
                box_2d_deltas, box_z_unscaled, box_z_scaled, box_dims, box_pose,
                proposals, scale_infos):
            boxes_ = (proposals_.pred_boxes if self.pred_proj_rel_pred_box
                      else proposals_.proposal_boxes)
            pred_proj_xy_ = boxes_[:, :2] + deltas_ * boxes_[:, 2:]
            if self.clamp_xy_to_border:
                lo = jnp.zeros((1, 2), dtype=pred_proj_xy_.dtype)
                hi = jnp.array([[clamp_shape[1], clamp_shape[0]]],
                               dtype=pred_proj_xy_.dtype)
                pred_proj_xy_ = jnp.clip(pred_proj_xy_, lo, hi)
            proposals_.pred_proj_xy = pred_proj_xy_
            proposals_.pred_z_unscaled = z_un_
            proposals_.pred_z_scaled = z_sc_
            proposals_.pred_dims = dims_
            proposals_.pred_pose = pose_
            if hasattr(info_, "pred_parameters"):
                proposals_._pred_parameters = info_.pred_parameters
                info_.pred_parameters = None
            if hasattr(info_, "pred_gravity"):
                proposals_._pred_gravity = info_.pred_gravity
                info_.pred_gravity = None
        return x  # forward returns x unchanged; predictions attached to proposals


# ---------------------------------------------------------------------------
# Pure-JAX reference for a correctness check
# ---------------------------------------------------------------------------
def _ref_forward(model, x, boxes, infos, clamp_shape):
    B, Q, D = x.shape
    h = x.reshape(B * Q, D)
    for i, (w, b) in enumerate(model.layers):
        h = h @ w + b
        if i < len(model.layers) - 1:
            h = jnp.maximum(h, 0.0)
    y = h.reshape(B, Q, -1)
    deltas, z_un, dims, pose = y[..., :2], y[..., 2:3], y[..., 3:6], y[..., 6:7]
    angles = jnp.concatenate((pose, jnp.zeros_like(pose), jnp.zeros_like(pose)), -1)
    pose_mat = euler_angles_to_matrix(angles.reshape(-1, 3), "YXZ").reshape(B, Q, 3, 3)
    dims_e = jnp.exp(jnp.minimum(dims, 5.0))
    z_scaled, dims_scaled, proj = [], [], []
    for b in range(B):
        shift, scale = jnp.split(infos[b].parameters, 2, axis=-1)
        z_scaled.append(scale * z_un[b] + shift)
        dims_scaled.append(scale * dims_e[b])
        p = boxes[b][:, :2] + deltas[b] * boxes[b][:, 2:]
        p = jnp.clip(p, jnp.zeros((1, 2), p.dtype),
                     jnp.array([[clamp_shape[1], clamp_shape[0]]], dtype=p.dtype))
        proj.append(p)
    return (jnp.stack(proj), z_un, jnp.stack(z_scaled), jnp.stack(dims_scaled), pose_mat)


if __name__ == "__main__":
    key = jax.random.PRNGKey(0)
    kx, kb, kp, km = jax.random.split(key, 4)

    # Small but tiling-exercising shapes: B=2, Q=128 queries, embed_dim=64
    # -> N = 256 rows, row tile capped to 64 (grid of 4 "parallel" steps).
    B, Q, D = 2, 128, 64
    H, W = 192, 256
    x = jax.random.normal(kx, (B, Q, D), dtype=jnp.float32)
    pred_boxes = jax.random.uniform(kb, (B, Q, 4), minval=1.0, maxval=128.0,
                                    dtype=jnp.float32)
    depth_params = jax.random.uniform(kp, (B, 1, 2), minval=0.5, maxval=2.0,
                                      dtype=jnp.float32)

    infos = [WhitenedDepthMeasurementInfo(depth_params[b]) for b in range(B)]
    sensor = {"image": _SensorEntry(_ImageData(jnp.zeros((B, 3, H, W), jnp.float32)),
                                    infos)}

    # --- f32-dot path: exact semantics check vs pure-JAX reference ---
    model_f32 = AbsoluteBox3DPredictorPallas(embed_dim=D, key=km,
                                             dot_dtype=jnp.float32)
    proposals_f32 = [Proposals(pred_boxes[b]) for b in range(B)]
    out = jax.block_until_ready(model_f32.forward(x, proposals_f32, sensor))

    proj_r, z_un_r, z_sc_r, dims_r, pose_r = _ref_forward(model_f32, x, pred_boxes,
                                                          infos, (H, W))
    assert out.shape == (B, Q, D) and bool(jnp.allclose(out, x))
    for b in range(B):
        assert jnp.allclose(proposals_f32[b].pred_proj_xy, proj_r[b], atol=1e-4, rtol=1e-4)
        assert jnp.allclose(proposals_f32[b].pred_z_unscaled, z_un_r[b], atol=1e-4, rtol=1e-4)
        assert jnp.allclose(proposals_f32[b].pred_z_scaled, z_sc_r[b], atol=1e-4, rtol=1e-4)
        assert jnp.allclose(proposals_f32[b].pred_dims, dims_r[b], atol=1e-4, rtol=1e-4)
        assert jnp.allclose(proposals_f32[b].pred_pose, pose_r[b], atol=1e-4, rtol=1e-4)
        assert proposals_f32[b].pred_pose.shape == (Q, 3, 3)

    # --- default path: bf16 hidden dots (f32 accumulate, f32 final dot/epilogue) ---
    model_bf16 = AbsoluteBox3DPredictorPallas(embed_dim=D, key=km)   # bf16 default
    proposals_bf16 = [Proposals(pred_boxes[b]) for b in range(B)]
    jax.block_until_ready(model_bf16.forward(x, proposals_bf16, sensor))
    for b in range(B):
        # deltas head is zero-initialized -> pred_proj_xy is exact on both paths
        assert jnp.allclose(proposals_bf16[b].pred_proj_xy, proj_r[b], atol=1e-4, rtol=1e-4)
        assert jnp.allclose(proposals_bf16[b].pred_z_scaled, z_sc_r[b], atol=5e-2, rtol=5e-2)
        assert jnp.allclose(proposals_bf16[b].pred_dims, dims_r[b], atol=5e-2, rtol=5e-2)
        assert jnp.allclose(proposals_bf16[b].pred_pose, pose_r[b], atol=5e-2, rtol=5e-2)

    print("KERNEL_OK")
</pallas_src>

<mosaic_0001>
module attributes {stable_mosaic.version = 11 : i64} {
  func.func @_mlp3_kernel(%arg0: i32, %arg1: memref<64x64xf32, #tpu.memory_space<vmem>>, %arg2: memref<64x64xf32, #tpu.memory_space<vmem>>, %arg3: memref<1x64xf32, #tpu.memory_space<vmem>>, %arg4: memref<64x64xf32, #tpu.memory_space<vmem>>, %arg5: memref<1x64xf32, #tpu.memory_space<vmem>>, %arg6: memref<64x8xf32, #tpu.memory_space<vmem>>, %arg7: memref<1x8xf32, #tpu.memory_space<vmem>>, %arg8: memref<64x8xf32, #tpu.memory_space<vmem>>) attributes {dimension_semantics = [#tpu.dimension_semantics<parallel>], iteration_bounds = array<i64: 4>, scalar_prefetch = 0 : i64, scratch_operands = 0 : i64, tpu.core_type = #tpu.core_type<tc>, window_params = [{transform_indices = @transform_0, window_bounds = array<i64: 64, 64>}, {pipeline_mode = #tpu.pipeline_mode<synchronous>, transform_indices = @transform_1, window_bounds = array<i64: 64, 64>}, {pipeline_mode = #tpu.pipeline_mode<synchronous>, transform_indices = @transform_2, window_bounds = array<i64: 1, 64>}, {pipeline_mode = #tpu.pipeline_mode<synchronous>, transform_indices = @transform_3, window_bounds = array<i64: 64, 64>}, {pipeline_mode = #tpu.pipeline_mode<synchronous>, transform_indices = @transform_4, window_bounds = array<i64: 1, 64>}, {pipeline_mode = #tpu.pipeline_mode<synchronous>, transform_indices = @transform_5, window_bounds = array<i64: 64, 8>}, {pipeline_mode = #tpu.pipeline_mode<synchronous>, transform_indices = @transform_6, window_bounds = array<i64: 1, 8>}, {transform_indices = @transform_7, window_bounds = array<i64: 64, 8>}]} {
    %c0 = arith.constant 0 : index
    %c0_0 = arith.constant 0 : index
    %0 = vector.load %arg1[%c0, %c0_0] : memref<64x64xf32, #tpu.memory_space<vmem>>, vector<64x64xf32>
    %c0_1 = arith.constant 0 : index
    %c0_2 = arith.constant 0 : index
    %1 = vector.load %arg2[%c0_1, %c0_2] : memref<64x64xf32, #tpu.memory_space<vmem>>, vector<64x64xf32>
    %cst = arith.constant dense<0.000000e+00> : vector<64x64xf32>
    %2 = tpu.matmul %0, %1, %cst {dimension_numbers = #tpu.dot_dimension_numbers<[1], [0], [0], [1], [0, 0, 1, 1], [], []>} : vector<64x64xf32>, vector<64x64xf32>, vector<64x64xf32> -> vector<64x64xf32>
    %c0_3 = arith.constant 0 : index
    %c0_4 = arith.constant 0 : index
    %3 = vector.load %arg3[%c0_3, %c0_4] : memref<1x64xf32, #tpu.memory_space<vmem>>, vector<1x64xf32>
    %4 = vector.broadcast %3 : vector<1x64xf32> to vector<64x64xf32>
    %5 = arith.addf %2, %4 : vector<64x64xf32>
    %cst_5 = arith.constant 0.000000e+00 : f32
    %6 = vector.broadcast %cst_5 : f32 to vector<64x64xf32>
    %7 = arith.maximumf %5, %6 : vector<64x64xf32>
    %c0_6 = arith.constant 0 : index
    %c0_7 = arith.constant 0 : index
    %8 = vector.load %arg4[%c0_6, %c0_7] : memref<64x64xf32, #tpu.memory_space<vmem>>, vector<64x64xf32>
    %cst_8 = arith.constant dense<0.000000e+00> : vector<64x64xf32>
    %9 = tpu.matmul %7, %8, %cst_8 {dimension_numbers = #tpu.dot_dimension_numbers<[1], [0], [0], [1], [0, 0, 1, 1], [], []>} : vector<64x64xf32>, vector<64x64xf32>, vector<64x64xf32> -> vector<64x64xf32>
    %c0_9 = arith.constant 0 : index
    %c0_10 = arith.constant 0 : index
    %10 = vector.load %arg5[%c0_9, %c0_10] : memref<1x64xf32, #tpu.memory_space<vmem>>, vector<1x64xf32>
    %11 = vector.broadcast %10 : vector<1x64xf32> to vector<64x64xf32>
    %12 = arith.addf %9, %11 : vector<64x64xf32>
    %cst_11 = arith.constant 0.000000e+00 : f32
    %13 = vector.broadcast %cst_11 : f32 to vector<64x64xf32>
    %14 = arith.maximumf %12, %13 : vector<64x64xf32>
    %c0_12 = arith.constant 0 : index
    %c0_13 = arith.constant 0 : index
    %15 = vector.load %arg6[%c0_12, %c0_13] : memref<64x8xf32, #tpu.memory_space<vmem>>, vector<64x8xf32>
    %cst_14 = arith.constant dense<0.000000e+00> : vector<64x8xf32>
    %16 = tpu.matmul %14, %15, %cst_14 {dimension_numbers = #tpu.dot_dimension_numbers<[1], [0], [0], [1], [0, 0, 1, 1], [], []>} : vector<64x64xf32>, vector<64x8xf32>, vector<64x8xf32> -> vector<64x8xf32>
    %c0_15 = arith.constant 0 : index
    %c0_16 = arith.constant 0 : index
    %17 = vector.load %arg7[%c0_15, %c0_16] : memref<1x8xf32, #tpu.memory_space<vmem>>, vector<1x8xf32>
    %18 = vector.broadcast %17 : vector<1x8xf32> to vector<64x8xf32>
    %19 = arith.addf %16, %18 : vector<64x8xf32>
    %c0_17 = arith.constant 0 : index
    %c0_18 = arith.constant 0 : index
    %20 = vector.load %arg8[%c0_17, %c0_18] : memref<64x8xf32, #tpu.memory_space<vmem>>, vector<64x8xf32>
    tpu.vector_store %arg8[%c0_17, %c0_18], %19 {strides = array<i32>} : memref<64x8xf32, #tpu.memory_space<vmem>>, vector<64x8xf32>,
    return
  }
  func.func @transform_0(%arg0: i32) -> (i32, i32) {
    %c0_i32 = arith.constant 0 : i32
    %c0_i32_0 = arith.constant 0 : i32
    return %arg0, %c0_i32 : i32, i32
  }
  func.func @transform_1(%arg0: i32) -> (i32, i32) {
    %c0_i32 = arith.constant 0 : i32
    %c0_i32_0 = arith.constant 0 : i32
    %c0_i32_1 = arith.constant 0 : i32
    return %c0_i32, %c0_i32_0 : i32, i32
  }
  func.func @transform_2(%arg0: i32) -> (i32, i32) {
    %c0_i32 = arith.constant 0 : i32
    %c0_i32_0 = arith.constant 0 : i32
    %c0_i32_1 = arith.constant 0 : i32
    return %c0_i32, %c0_i32_0 : i32, i32
  }
  func.func @transform_3(%arg0: i32) -> (i32, i32) {
    %c0_i32 = arith.constant 0 : i32
    %c0_i32_0 = arith.constant 0 : i32
    %c0_i32_1 = arith.constant 0 : i32
    return %c0_i32, %c0_i32_0 : i32, i32
  }
  func.func @transform_4(%arg0: i32) -> (i32, i32) {
    %c0_i32 = arith.constant 0 : i32
    %c0_i32_0 = arith.constant 0 : i32
    %c0_i32_1 = arith.constant 0 : i32
    return %c0_i32, %c0_i32_0 : i32, i32
  }
  func.func @transform_5(%arg0: i32) -> (i32, i32) {
    %c0_i32 = arith.constant 0 : i32
    %c0_i32_0 = arith.constant 0 : i32
    %c0_i32_1 = arith.constant 0 : i32
    return %c0_i32, %c0_i32_0 : i32, i32
  }
  func.func @transform_6(%arg0: i32) -> (i32, i32) {
    %c0_i32 = arith.constant 0 : i32
    %c0_i32_0 = arith.constant 0 : i32
    %c0_i32_1 = arith.constant 0 : i32
    return %c0_i32, %c0_i32_0 : i32, i32
  }
  func.func @transform_7(%arg0: i32) -> (i32, i32) {
    %c0_i32 = arith.constant 0 : i32
    %c0_i32_0 = arith.constant 0 : i32
    return %arg0, %c0_i32 : i32, i32
  }
}

</mosaic_0001>

<bundles_post_ra>
// kernel: tpu_custom_call.1
= control target key start
LH: loop header
LB: loop body
LE: loop exit
PB: predicated region body
PF: predicated region fallthrough
CT: control target
= control target key end

     0   :  { %s1086_s24 = smov 0   ;;  %s1223_s0 = inlined_call_operand.vmem [shape: f32[256,64], index: 0, kind: input, shape index: {}]   ;;  %s1224_s1 = inlined_call_operand.vmem [shape: f32[64,64], index: 1, kind: input, shape index: {}]   ;;  %s1225_s2 = inlined_call_operand.vmem [shape: f32[1,64], index: 2, kind: input, shape index: {}]   ;;  %s1226_s3 = inlined_call_operand.vmem [shape: f32[64,64], index: 3, kind: input, shape index: {}]   ;;  %s1227_s4 = inlined_call_operand.vmem [shape: f32[1,64], index: 4, kind: input, shape index: {}]   ;;  %s1228_s5 = inlined_call_operand.vmem [shape: f32[64,8], index: 5, kind: input, shape index: {}]   ;;  %s1229_s6 = inlined_call_operand.vmem [shape: f32[1,8], index: 6, kind: input, shape index: {}]   ;;  %s1230_s7 = inlined_call_operand.vmem [shape: f32[256,8], index: 7, kind: output, shape index: {}]  }
   0x1 LB: > { %s804_s25 = sadd.s32 4294967295, %s1044_s24   ;;  %p808_p0 = scmp.ge.s32.totalorder %s1044_s24, 1  ;;  %s1044_s24 = sphi %s1086_s24, %s17_s24  }
   0x2   : > { %p238_p1 = scmp.lt.s32.totalorder %s1044_s24, 5 }
   0x4   : > { %p239_p2 = pnand %p808_p0, %p238_p1 }
   0x5   : > { %v290_v0 = vld [vmem:[%s1224_s1] sm:$0xff] (!%p239_p2)  ;;  %v291_v1 = vld [vmem:[%s1224_s1 + $0x8] sm:$0xff] (!%p239_p2)  ;;  %v292_v2 = vld [vmem:[%s1224_s1 + $0x10] sm:$0xff] (!%p239_p2)  ;;  %s809_s9 = sshll.u32 (!%p239_p2), %s804_s25, 3  ;;  %vm305_vm0 = vcmask (!%p239_p2), 523264   ;;  %vm739_vm1 = vcmask (!%p239_p2), 64512  }
   0x6   : > { %242 = sbr.rel (%p239_p2) target bundleno = 688 (0x2b0), region = 48  ;;  %v974_v3 = vpack.c.bf16 (!%p239_p2), %v291_v1, %v290_v0  ;;  %v293_v4 = vld [vmem:[%s1224_s1 + $0x18] sm:$0xff] (!%p239_p2)  ;;  %p271_p3 = scmp.lt.s32.totalorder (!%p239_p2), %s809_s9, 31  ;;  %v294_v6 = vld [vmem:[%s1224_s1 + $0x20] sm:$0xff] (!%p239_p2)  ;;  %v295_v7 = vld [vmem:[%s1224_s1 + $0x28] sm:$0xff] (!%p239_p2) }
   0x7   : > { %v978_v5 = vpack.c.bf16 (!%p239_p2), %v293_v4, %v292_v2  ;;  %v443_v8 = vld [vmem:[%s1226_s3] sm:$0xff] (!%p239_p2)  ;;  %v444_v9 = vld [vmem:[%s1226_s3 + $0x8] sm:$0xff] (!%p239_p2)  ;;  %v445_v10 = vld [vmem:[%s1226_s3 + $0x10] sm:$0xff] (!%p239_p2)  ;;  %v982_v13 = vpack.c.bf16 (!%p239_p2), %v295_v7, %v294_v6 }
   0x8   : > { %975 = vmatprep.subr.bf16.mxu0 (!%p239_p2), %v974_v3  ;;  %v446_v11 = vld [vmem:[%s1226_s3 + $0x18] sm:$0xff] (!%p239_p2)  ;;  %v990_v12 = vpack.c.bf16 (!%p239_p2), %v444_v9, %v443_v8  ;;  %v447_v15 = vld [vmem:[%s1226_s3 + $0x20] sm:$0xff] (!%p239_p2)  ;;  %v448_v16 = vld [vmem:[%s1226_s3 + $0x28] sm:$0xff] (!%p239_p2) }
   0x9   : > { %977 = vmatpush3.bf16.msra.mxu0 (!%p239_p2), %v974_v3  ;;  %v994_v14 = vpack.c.bf16 (!%p239_p2), %v446_v11, %v445_v10  ;;  %v296_v17 = vld [vmem:[%s1224_s1 + $0x30] sm:$0xff] (!%p239_p2)  ;;  %v297_v18 = vld [vmem:[%s1224_s1 + $0x38] sm:$0xff] (!%p239_p2)  ;;  %v998_v20 = vpack.c.bf16 (!%p239_p2), %v448_v16, %v447_v15  ;;  %v595_v32 = vld [vmem:[%s1228_s5] sm:$0xff] (!%p239_p2) }
   0xa   : > { %979 = vmatprep.subr.bf16.mxu0 (!%p239_p2), %v978_v5  ;;  %991 = vmatprep.subr.bf16.mxu1 (!%p239_p2), %v990_v12  ;;  %v986_v21 = vpack.c.bf16 (!%p239_p2), %v297_v18, %v296_v17  ;;  %v449_v29 = vld [vmem:[%s1226_s3 + $0x30] sm:$0xff] (!%p239_p2)  ;;  %v450_v30 = vld [vmem:[%s1226_s3 + $0x38] sm:$0xff] (!%p239_p2)  ;;  %v596_v33 = vld [vmem:[%s1228_s5 + $0x8] sm:$0xff] (!%p239_p2) }
   0xb   : > { %993 = vmatpush3.bf16.msra.mxu1 (!%p239_p2), %v990_v12  ;;  %v1002_v31 = vpack.c.bf16 (!%p239_p2), %v450_v30, %v449_v29  ;;  %v597_v34 = vld [vmem:[%s1228_s5 + $0x10] sm:$0xff] (!%p239_p2)  ;;  %v1006_v35 = vpack.c.bf16 (!%p239_p2), %v596_v33, %v595_v32  ;;  %v598_v36 = vld [vmem:[%s1228_s5 + $0x18] sm:$0xff] (!%p239_p2)  ;;  %v599_v38 = vld [vmem:[%s1228_s5 + $0x20] sm:$0xff] (!%p239_p2) }
   0xc   : > { %995 = vmatprep.subr.bf16.mxu1 (!%p239_p2), %v994_v14  ;;  %v1010_v37 = vpack.c.bf16 (!%p239_p2), %v598_v36, %v597_v34  ;;  %v600_v39 = vld [vmem:[%s1228_s5 + $0x28] sm:$0xff] (!%p239_p2)  ;;  %v813_v41 = vld [vmem:[%s1225_s2] ss:$0 sm:$0xff] (!%p239_p2)  ;;  %v601_v2 = vld [vmem:[%s1228_s5 + $0x30] sm:$0xff] (!%p239_p2) }
   0xd   : > { %s1232_s9 = smov (!%p271_p3, %s809_s9), 31  ;;  %981 = vmatpush3.bf16.msra.mxu0 %v978_v5  ;;  %v1014_v40 = vpack.c.bf16 %v600_v39, %v599_v38  ;;  %v602_v3 = vld [vmem:[%s1228_s5 + $0x38] sm:$0xff]  ;;  %v822_v5 = vld [vmem:[%s1227_s4] ss:$0 sm:$0xff] }
   0xe   : > { %s810_s25 = sshll.u32 %s1232_s9, 3  ;;  %983 = vmatprep.subr.bf16.mxu0 %v982_v13  ;;  %v1018_v4 = vpack.c.bf16 %v602_v3, %v601_v2  ;;  %v831_v30 = vld [vmem:[%s1229_s6] ss:$0 sm:$0xff] }
   0xf   : > { %s274_s14 = scalar_lea.vmem %s1223_s0, %s810_s25  ;;  %997 = vmatpush3.bf16.msra.mxu1 %v994_v14  ;;  %s280_s23 = scalar_lea.vmem %s1230_s7, %s810_s25 }
  0x10   : > { %v282_v19 = vld [vmem:[%s274_s14] sm:$0xff]  ;;  %999 = vmatprep.subr.bf16.mxu1 %v998_v20  ;;  %v283_v22 = vld [vmem:[%s274_s14 + $0x8] sm:$0xff]  ;;  %v284_v23 = vld [vmem:[%s274_s14 + $0x10] sm:$0xff] }
  0x11   : > { %906 = vmatprep.mubr.msk.f32.mxu0 %vm305_vm0, %v282_v19  ;;  %985 = vmatpush3.bf16.msra.mxu0 %v982_v13  ;;  %v285_v24 = vld [vmem:[%s274_s14 + $0x18] sm:$0xff]  ;;  %v286_v25 = vld [vmem:[%s274_s14 + $0x20] sm:$0xff]  ;;  %v287_v26 = vld [vmem:[%s274_s14 + $0x28] sm:$0xff] }
  0x12   : > { %987 = vmatprep.subr.bf16.mxu0 %v986_v21  ;;  %v288_v27 = vld [vmem:[%s274_s14 + $0x30] sm:$0xff]  ;;  %v289_v28 = vld [vmem:[%s274_s14 + $0x38] sm:$0xff] }
  0x13   : > { %1001 = vmatpush3.bf16.msra.mxu1 %v998_v20 }
  0x14   : > { %1003 = vmatprep.subr.bf16.mxu1 %v1002_v31 }
  0x15   : > { %989 = vmatpush3.bf16.msra.mxu0 %v986_v21 }
  0x16   : > { %1007 = vmatprep.subr.bf16.mxu0 %v1006_v35 }
  0x17   : > { %1005 = vmatpush3.bf16.msra.mxu1 %v1002_v31 }
  0x18   : > { %907 = vmatmul.mubr.msk.f32.vlgmr.msra.gmra.mrb[0].mxu0 %vm305_vm0, %v283_v22  ;;  %1022 = vmatprep.subr.bf16.mxu1 %v1006_v35 }
  0x19   : > { %909 = vmatprep.mubr.msk.f32.mxu0 %vm305_vm0, %v284_v23  ;;  %1009 = vmatpush3.bf16.msra.mxu0 %v1006_v35 }
  0x1a   : > { %1011 = vmatprep.subr.bf16.mxu0 %v1010_v37 }
  0x1c   : > { %910 = vmatmul.mubr.msk.f32.gmra.mrb[2].mxu0 %vm305_vm0, %v285_v24 }
  0x1d   : > { %912 = vmatprep.mubr.msk.f32.mxu0 %vm305_vm0, %v286_v25  ;;  %1013 = vmatpush3.bf16.msra.mxu0 %v1010_v37 }
  0x1e   : > { %1015 = vmatprep.subr.bf16.mxu0 %v1014_v40 }
  0x20   : > { %913 = vmatmul.mubr.msk.f32.gmra.mrb[4].mxu0 %vm305_vm0, %v287_v26 }
  0x21   : > { %915 = vmatprep.mubr.msk.f32.mxu0 %vm305_vm0, %v288_v27  ;;  %1017 = vmatpush3.bf16.msra.mxu0 %v1014_v40 }
  0x22   : > { %1019 = vmatprep.subr.bf16.mxu0 %v1018_v4 }
  0x24   : > { %916 = vmatmul.mubr.msk.f32.gmra.mrb[6].mxu0 %vm305_vm0, %v289_v28 }
  0x25   : > { %1021 = vmatpush3.bf16.msra.mxu0 %v1018_v4 }
  0xeb   : > { %v908_v42 = vpop.f32.mrb[0].mxu0 }
  0xec   : > { %v402_v43 = vadd.f32 %v908_v42, %v813_v41  ;;  %v396_v44 = vpop.f32.mrb[1].mxu0 }
  0xed   : > { %v397_v45 = vadd.f32 %v813_v41, %v396_v44 }
  0xee   : > { %v436_v48 = vmax.f32 %v402_v43, 0.0 }
  0xef   : > { %v435_v46 = vmax.f32 %v397_v45, 0.0  ;;  %v911_v47 = vpop.f32.mrb[2].mxu0 }
  0xf0   : > { %v412_v49 = vadd.f32 %v911_v47, %v813_v41  ;;  %v406_v50 = vpop.f32.mrb[3].mxu0 }
  0xf1   : > { %v407_v51 = vadd.f32 %v813_v41, %v406_v50  ;;  %934 = vmatprep.mubr.msk.f32.mxu1 %vm305_vm0, %v435_v46 }
  0xf2   : > { %935 = vmatmul.mubr.msk.f32.vlgmr.msra.gmra.mrb[0].mxu1 %vm305_vm0, %v436_v48  ;;  %v438_v54 = vmax.f32 %v412_v49, 0.0 }
  0xf3   : > { %v437_v52 = vmax.f32 %v407_v51, 0.0  ;;  %v914_v53 = vpop.f32.mrb[4].mxu0  ;;  %1026 = vmatpush3.bf16.msra.mxu1 %v1006_v35 }
  0xf4   : > { %v422_v55 = vadd.f32 %v914_v53, %v813_v41  ;;  %v416_v56 = vpop.f32.mrb[5].mxu0  ;;  %1023 = vmatprep.subr.bf16.mxu1 %v1010_v37 }
  0xf5   : > { %v417_v57 = vadd.f32 %v813_v41, %v416_v56  ;;  %937 = vmatprep.mubr.msk.f32.mxu1 %vm305_vm0, %v437_v52 }
  0xf6   : > { %938 = vmatmul.mubr.msk.f32.gmra.mrb[2].mxu1 %vm305_vm0, %v438_v54  ;;  %v440_v60 = vmax.f32 %v422_v55, 0.0 }
  0xf7   : > { %v439_v58 = vmax.f32 %v417_v57, 0.0  ;;  %v917_v59 = vpop.f32.mrb[6].mxu0  ;;  %1027 = vmatpush3.bf16.msra.mxu1 %v1010_v37 }
  0xf8   : > { %v432_v61 = vadd.f32 %v917_v59, %v813_v41  ;;  %v426_v62 = vpop.f32.mrb[7].mxu0  ;;  %1024 = vmatprep.subr.bf16.mxu1 %v1014_v40 }
  0xf9   : > { %v427_v63 = vadd.f32 %v813_v41, %v426_v62  ;;  %940 = vmatprep.mubr.msk.f32.mxu1 %vm305_vm0, %v439_v58 }
  0xfa   : > { %941 = vmatmul.mubr.msk.f32.gmra.mrb[4].mxu1 %vm305_vm0, %v440_v60  ;;  %v442_v1 = vmax.f32 %v432_v61, 0.0 }
  0xfb   : > { %v441_v0 = vmax.f32 %v427_v63, 0.0  ;;  %1028 = vmatpush3.bf16.msra.mxu1 %v1014_v40 }
  0xfc   : > { %1025 = vmatprep.subr.bf16.mxu1 %v1018_v4 }
  0xfd   : > { %943 = vmatprep.mubr.msk.f32.mxu1 %vm305_vm0, %v441_v0 }
  0xfe   : > { %944 = vmatmul.mubr.msk.f32.gmra.mrb[6].mxu1 %vm305_vm0, %v442_v1 }
  0xff   : > { %1029 = vmatpush3.bf16.msra.mxu1 %v1018_v4 }
 0x1c5   : > { %v936_v6 = vpop.f32.mrb[0].mxu1 }
 0x1c6   : > { %v554_v7 = vadd.f32 %v936_v6, %v822_v5  ;;  %v548_v8 = vpop.f32.mrb[1].mxu1 }
 0x1c7   : > { %v549_v9 = vadd.f32 %v822_v5, %v548_v8 }
 0x1c8   : > { %v588_v12 = vmax.f32 %v554_v7, 0.0 }
 0x1c9   : > { %v587_v10 = vmax.f32 %v549_v9, 0.0  ;;  %v939_v11 = vpop.f32.mrb[2].mxu1 }
 0x1ca   : > { %v564_v13 = vadd.f32 %v939_v11, %v822_v5  ;;  %v558_v14 = vpop.f32.mrb[3].mxu1 }
 0x1cb   : > { %v559_v15 = vadd.f32 %v822_v5, %v558_v14  ;;  %962 = vmatprep.mubr.msk.f32.mxu0 %vm305_vm0, %v587_v10 }
 0x1cc   : > { %963 = vmatmul.mubr.msk.f32.vlgmr.msra.gmra.mrb[8].mxu0 %vm305_vm0, %v588_v12  ;;  %v590_v18 = vmax.f32 %v564_v13, 0.0 }
 0x1cd   : > { %v589_v16 = vmax.f32 %v559_v15, 0.0  ;;  %v942_v17 = vpop.f32.mrb[4].mxu1 }
 0x1ce   : > { %v574_v19 = vadd.f32 %v942_v17, %v822_v5  ;;  %v568_v20 = vpop.f32.mrb[5].mxu1 }
 0x1cf   : > { %v569_v21 = vadd.f32 %v822_v5, %v568_v20  ;;  %965 = vmatprep.mubr.msk.f32.mxu0 %vm305_vm0, %v589_v16 }
 0x1d0   : > { %966 = vmatmul.mubr.msk.f32.gmra.mrb[10].mxu0 %vm305_vm0, %v590_v18  ;;  %v592_v24 = vmax.f32 %v574_v19, 0.0 }
 0x1d1   : > { %v591_v22 = vmax.f32 %v569_v21, 0.0  ;;  %v945_v23 = vpop.f32.mrb[6].mxu1 }
 0x1d2   : > { %v584_v25 = vadd.f32 %v945_v23, %v822_v5  ;;  %v578_v26 = vpop.f32.mrb[7].mxu1 }
 0x1d3   : > { %v579_v27 = vadd.f32 %v822_v5, %v578_v26  ;;  %968 = vmatprep.mubr.msk.f32.mxu1 %vm305_vm0, %v591_v22 }
 0x1d4   : > { %969 = vmatmul.mubr.msk.f32.vlgmr.msra.gmra.mrb[8].mxu1 %vm305_vm0, %v592_v24  ;;  %v594_v29 = vmax.f32 %v584_v25, 0.0 }
 0x1d5   : > { %v593_v28 = vmax.f32 %v579_v27, 0.0 }
 0x1d7   : > { %971 = vmatprep.mubr.msk.f32.mxu1 %vm305_vm0, %v593_v28 }
 0x1d8   : > { %972 = vmatmul.mubr.msk.f32.gmra.mrb[10].mxu1 %vm305_vm0, %v594_v29 }
 0x29f   : > { %v964_v31 = vpop.f32.mrb[8].mxu0 }
 0x2a0   : > { %v706_v32 = vadd.f32 %v964_v31, %v831_v30  ;;  %v700_v33 = vpop.f32.mrb[9].mxu0 }
 0x2a1   : > { %v701_v34 = vadd.f32 %v831_v30, %v700_v33 }
 0x2a2   : > { %741 = vst.msk [vmem:[%s280_s23 + $0x8] sm:$0xff] %vm739_vm1, %v706_v32 }
 0x2a3   : > { %740 = vst.msk [vmem:[%s280_s23] sm:$0xff] %vm739_vm1, %v701_v34  ;;  %v967_v35 = vpop.f32.mrb[10].mxu0 }
 0x2a4   : > { %v716_v36 = vadd.f32 %v967_v35, %v831_v30  ;;  %v710_v37 = vpop.f32.mrb[11].mxu0 }
 0x2a5   : > { %v711_v38 = vadd.f32 %v831_v30, %v710_v37 }
 0x2a6   : > { %743 = vst.msk [vmem:[%s280_s23 + $0x18] sm:$0xff] %vm739_vm1, %v716_v36 }
 0x2a7   : > { %742 = vst.msk [vmem:[%s280_s23 + $0x10] sm:$0xff] %vm739_vm1, %v711_v38  ;;  %v970_v39 = vpop.f32.mrb[8].mxu1 }
 0x2a8   : > { %v726_v40 = vadd.f32 %v970_v39, %v831_v30  ;;  %v720_v41 = vpop.f32.mrb[9].mxu1 }
 0x2a9   : > { %v721_v42 = vadd.f32 %v831_v30, %v720_v41 }
 0x2aa   : > { %745 = vst.msk [vmem:[%s280_s23 + $0x28] sm:$0xff] %vm739_vm1, %v726_v40 }
 0x2ab   : > { %744 = vst.msk [vmem:[%s280_s23 + $0x20] sm:$0xff] %vm739_vm1, %v721_v42  ;;  %v973_v43 = vpop.f32.mrb[10].mxu1 }
 0x2ac   : > { %v736_v44 = vadd.f32 %v973_v43, %v831_v30  ;;  %v730_v45 = vpop.f32.mrb[11].mxu1 }
 0x2ad   : > { %v731_v46 = vadd.f32 %v831_v30, %v730_v45 }
 0x2ae   : > { %747 = vst.msk [vmem:[%s280_s23 + $0x38] sm:$0xff] %vm739_vm1, %v736_v44 }
 0x2af   : > { %746 = vst.msk [vmem:[%s280_s23 + $0x30] sm:$0xff] %vm739_vm1, %v731_v46 }
 0x2b0 PF: > { %s17_s24 = sadd.s32 1, %s1044_s24  }
 0x2b1   : > { %p14_p4 = scmp.ge.s32.totalorder %s17_s24, 6  }
 0x2b3   :  { %16 = sbr.rel (!%p14_p4) target bundleno = 1 (0x1), region = 78 }

</bundles_post_ra>
